<compile_context>
chip_gen: v5e
topology: v5e:2x2
jax: 0.10.0
libtpu: 0.0.40
codegen_flags: <defaults>
</compile_context>

<pallas_src>
import functools

import jax
import jax.numpy as jnp
from jax.experimental import pallas as pl
from jax.experimental.pallas import tpu as pltpu


def _round_up(x, m):
    return (x + m - 1) // m * m


def _weight_norm(v, g):
    # torch weight_norm default dim=0 on a ConvTranspose2d weight (Cin, Cout, KH, KW):
    # per input-channel slice, norm taken over dims (1, 2, 3).
    norm = jnp.sqrt(jnp.sum(v * v, axis=(1, 2, 3), keepdims=True))
    return g * v / norm


def _polyphase_kernel(x_ref, wx_ref, ws_ref, b_ref, o_ref, *, TR, W, Cin):
    """One grid step: TR merged (batch*row) input rows -> TR phase-packed output rows.

    x_ref : (TR, W, Cin)       un-dilated input rows (no padding)
    wx_ref: (Cin, 4*Cout_p)    phase-packed weights multiplying x[i, j]
    ws_ref: (Cin, 4*Cout_p)    phase-packed weights multiplying x[i, j+1]
    b_ref : (1, 4*Cout_p)      bias replicated across the 4 phases (f32)
    o_ref : (TR, W, 4*Cout_p)  phase-packed output, written in the compute dtype
    """
    x = x_ref[...]                                            # (TR, W, Cin)
    # Column-shifted copy within each row: x_sh[r, j] = x[r, j+1], zero at j = W-1.
    # Sublane-axis slice + concat (exact).  TODO(synk): pltpu.roll + iota mask would
    # move this copy onto the otherwise-idle XLU; matters most on v5e (1 vst slot).
    x_sh = jnp.concatenate(
        [x[:, 1:, :], jnp.zeros((TR, 1, Cin), x.dtype)], axis=1)
    xf = x.reshape(TR * W, Cin)
    xsf = x_sh.reshape(TR * W, Cin)
    # Two MXU matmuls (no lane-axis concat of the K operand), f32 accumulation.
    # TODO(synk): on v5e, if MXU-bound, split the q==0 phases out of the second dot
    # (its q==0 columns are structurally zero) to drop 25% of the FLOPs.
    acc = jnp.dot(xf, wx_ref[...], preferred_element_type=jnp.float32)
    acc = acc + jnp.dot(xsf, ws_ref[...], preferred_element_type=jnp.float32)
    acc = acc + b_ref[...]                                    # one broadcast add
    o_ref[...] = acc.reshape(TR, W, -1).astype(o_ref.dtype)


def down_shifted_deconv2d_pallas(x_nchw, v, g, b,
                                 filter_size=(2, 3), stride=(2, 2),
                                 output_padding=1, *,
                                 compute_dtype=jnp.bfloat16,
                                 return_packed=False):
    """Forward of down_shifted_deconv2d (stride (2,2) config used by ImageDecoder).

    compute_dtype: dtype of the in-kernel operands AND of the phase-packed HBM
      output (MXU accumulation is always f32).  bf16 default per v6e/v7x guidance;
      pass jnp.float32 for exact-match numerics.
    return_packed: if True, skip the NCHW conversion pass and return the
      phase-packed tensor (N, H, W, 2, 2, Cout_p) with axes (n, i, j, p, q, c),
      where output pixel (2i+p, 2j+q) = packed[n, i, j, p, q, :Cout].
    """
    assert tuple(filter_size) == (2, 3)
    assert tuple(stride) == (2, 2)
    assert output_padding == 1
    N, Cin, H, W = x_nchw.shape
    Cout = v.shape[1]
    Hc, Wc = 2 * H, 2 * W            # cropped ConvTranspose2d output for this config

    w_n = _weight_norm(v.astype(jnp.float32), g.astype(jnp.float32))  # (Cin, Cout, 2, 3)

    # ---- phase-packed weights, phase index ph = 2*p + q ----
    # out[2i+p, 2j+q] = x[i, j] . W[:, :, p, 1]                                (q == 0)
    #                 = x[i, j] . W[:, :, p, 2] + x[i, j+1] . W[:, :, p, 0]    (q == 1)
    Cout_p = _round_up(Cout, 32)     # 4*Cout_p % 128 == 0 -> lane-dense packed output
    Np = 4 * Cout_p
    w_pad = jnp.pad(w_n, ((0, 0), (0, Cout_p - Cout), (0, 0), (0, 0)))
    zero = jnp.zeros((Cin, Cout_p), jnp.float32)
    w_x = jnp.stack([w_pad[:, :, 0, 1], w_pad[:, :, 0, 2],          # from x[i, j]
                     w_pad[:, :, 1, 1], w_pad[:, :, 1, 2]], axis=1)
    w_s = jnp.stack([zero, w_pad[:, :, 0, 0],                       # from x[i, j+1]
                     zero, w_pad[:, :, 1, 0]], axis=1)
    w_x = w_x.reshape(Cin, Np).astype(compute_dtype)
    w_s = w_s.reshape(Cin, Np).astype(compute_dtype)
    b_pack = jnp.tile(jnp.pad(b.astype(jnp.float32), (0, Cout_p - Cout)), 4)
    b_pack = b_pack.reshape(1, Np)

    # ---- layout glue: NCHW contract -> NHWC with batch and rows merged ----
    x2d = jnp.transpose(x_nchw, (0, 2, 3, 1)).astype(compute_dtype)  # (N, H, W, Cin)
    x2d = x2d.reshape(N * H, W, Cin)
    NH = N * H

    # ---- per-generation VMEM budget -> largest row tile that fits ----
    try:
        vmem_cap = int(pltpu.get_tpu_info().vmem_capacity_bytes)
    except Exception:
        vmem_cap = 64 * 1024 * 1024          # conservative: v7x physical VMEM per TC
    vmem_limit = min(int(vmem_cap * 3 // 4), 96 * 1024 * 1024)

    cbytes = jnp.dtype(compute_dtype).itemsize
    per_row = W * (2 * Cin * cbytes          # input block, double-buffered
                   + 2 * Cin * cbytes        # in-kernel x load + shifted-copy temp
                   + 2 * Np * cbytes         # output block, double-buffered
                   + 2 * Np * 4)             # f32 accumulator + dot temporary
    fixed = (2 * 2 * Cin * Np * cbytes       # two weight blocks (double-buffered;
             + 2 * Np * 4                    #  tiny vs. the row blocks) + bias
             + (2 << 20))                    # compiler-internal scratch slack
    TR = int(max(1, min(NH, (vmem_limit - fixed) // per_row)))

    kernel = functools.partial(_polyphase_kernel, TR=TR, W=W, Cin=Cin)

    out_packed = pl.pallas_call(
        kernel,
        out_shape=jax.ShapeDtypeStruct((NH, W, Np), compute_dtype),
        grid=(pl.cdiv(NH, TR),),             # padded tail block is fine: rows are
        in_specs=[                           # independent, OOB writes are dropped
            pl.BlockSpec((TR, W, Cin), lambda t: (t, 0, 0)),
            pl.BlockSpec((Cin, Np), lambda t: (0, 0)),
            pl.BlockSpec((Cin, Np), lambda t: (0, 0)),
            pl.BlockSpec((1, Np), lambda t: (0, 0)),
        ],
        out_specs=pl.BlockSpec((TR, W, Np), lambda t: (t, 0, 0)),
        compiler_params=pltpu.CompilerParams(
            dimension_semantics=("parallel",),   # no carried state across rows
            vmem_limit_bytes=vmem_limit),
    )(x2d, w_x, w_s, b_pack)

    packed6 = out_packed.reshape(N, H, W, 2, 2, Cout_p)    # (n, i, j, p, q, c) — free
    if return_packed:
        return packed6                                     # consumer fuses de-interleave

    # Single fused XLA pass: de-interleave phases + go back to the module's NCHW.
    out = jnp.transpose(packed6, (0, 5, 1, 3, 2, 4))       # (n, c, i, p, j, q)
    out = out.reshape(N, Cout_p, Hc, Wc)[:, :Cout]
    return out.astype(x_nchw.dtype)


def _reference(x_nchw, v, g, b, filter_size=(2, 3), stride=(2, 2), output_padding=1):
    """Pure-JAX reference for ConvTranspose2d(weight_norm) + PixelCNN++ crop."""
    KH, KW = filter_size
    SH, SW = stride
    OP = output_padding
    w_n = _weight_norm(v, g)
    full = jax.lax.conv_general_dilated(
        x_nchw, jnp.flip(w_n, (2, 3)),
        window_strides=(1, 1),
        padding=((KH - 1, KH - 1 + OP), (KW - 1, KW - 1 + OP)),
        lhs_dilation=(SH, SW),
        dimension_numbers=('NCHW', 'IOHW', 'NCHW'),
    ) + b[None, :, None, None]
    H_out, W_out = full.shape[2], full.shape[3]
    CL = (KW - 1) // 2
    return full[:, :, :H_out - KH + 1, CL:W_out - CL]


if __name__ == "__main__":
    N, Cin, Cout, H, W = 2, 4, 4, 16, 16
    filter_size, stride, output_padding = (2, 3), (2, 2), 1

    key = jax.random.PRNGKey(0)
    k1, k2, k3, k4 = jax.random.split(key, 4)
    x = jax.random.normal(k1, (N, Cin, H, W), jnp.float32)
    v = 0.05 * jax.random.normal(k2, (Cin, Cout, filter_size[0], filter_size[1]),
                                 jnp.float32)
    g = 1.0 + 0.1 * jax.random.normal(k3, (Cin, 1, 1, 1), jnp.float32)
    b = 0.1 * jax.random.normal(k4, (Cout,), jnp.float32)

    ref = _reference(x, v, g, b, filter_size, stride, output_padding)

    # f32 compute path — tight check against the pure-JAX reference.
    out_f32 = down_shifted_deconv2d_pallas(
        x, v, g, b, filter_size, stride, output_padding,
        compute_dtype=jnp.float32)
    out_f32 = jax.block_until_ready(out_f32)
    assert out_f32.shape == ref.shape == (N, Cout, 2 * H, 2 * W), (out_f32.shape,
                                                                   ref.shape)
    assert jnp.allclose(out_f32, ref, atol=1e-3, rtol=1e-3), float(
        jnp.max(jnp.abs(out_f32 - ref)))

    # Default bf16 compute path (f32 MXU accumulation, bf16 HBM output) — looser tol.
    out_bf16 = down_shifted_deconv2d_pallas(
        x, v, g, b, filter_size, stride, output_padding)
    out_bf16 = jax.block_until_ready(out_bf16)
    assert out_bf16.shape == ref.shape
    assert jnp.allclose(out_bf16, ref, atol=5e-2, rtol=5e-2), float(
        jnp.max(jnp.abs(out_bf16 - ref)))

    print("KERNEL_OK")
</pallas_src>

<mosaic_0001>
module attributes {stable_mosaic.version = 11 : i64} {
  func.func @_polyphase_kernel(%arg0: i32, %arg1: memref<32x16x4xf32, #tpu.memory_space<vmem>>, %arg2: memref<4x128xf32, #tpu.memory_space<vmem>>, %arg3: memref<4x128xf32, #tpu.memory_space<vmem>>, %arg4: memref<1x128xf32, #tpu.memory_space<vmem>>, %arg5: memref<32x16x128xf32, #tpu.memory_space<vmem>>) attributes {dimension_semantics = [#tpu.dimension_semantics<parallel>], iteration_bounds = array<i64: 1>, scalar_prefetch = 0 : i64, scratch_operands = 0 : i64, tpu.core_type = #tpu.core_type<tc>, window_params = [{transform_indices = @transform_0, window_bounds = array<i64: 32, 16, 4>}, {pipeline_mode = #tpu.pipeline_mode<synchronous>, transform_indices = @transform_1, window_bounds = array<i64: 4, 128>}, {pipeline_mode = #tpu.pipeline_mode<synchronous>, transform_indices = @transform_2, window_bounds = array<i64: 4, 128>}, {pipeline_mode = #tpu.pipeline_mode<synchronous>, transform_indices = @transform_3, window_bounds = array<i64: 1, 128>}, {transform_indices = @transform_4, window_bounds = array<i64: 32, 16, 128>}]} {
    %c0 = arith.constant 0 : index
    %c0_0 = arith.constant 0 : index
    %c0_1 = arith.constant 0 : index
    %0 = vector.load %arg1[%c0, %c0_0, %c0_1] : memref<32x16x4xf32, #tpu.memory_space<vmem>>, vector<32x16x4xf32>
    %1 = vector.extract_strided_slice %0 {offsets = [0, 1, 0], sizes = [32, 15, 4], strides = [1, 1, 1]} : vector<32x16x4xf32> to vector<32x15x4xf32>
    %cst = arith.constant 0.000000e+00 : f32
    %2 = vector.broadcast %cst : f32 to vector<32x1x4xf32>
    %3 = tpu.concatenate %1, %2 in 1 : vector<32x15x4xf32>, vector<32x1x4xf32> -> vector<32x16x4xf32>
    %4 = vector.shape_cast %0 : vector<32x16x4xf32> to vector<512x4xf32>
    %5 = vector.shape_cast %3 : vector<32x16x4xf32> to vector<512x4xf32>
    %c0_2 = arith.constant 0 : index
    %c0_3 = arith.constant 0 : index
    %6 = vector.load %arg2[%c0_2, %c0_3] : memref<4x128xf32, #tpu.memory_space<vmem>>, vector<4x128xf32>
    %cst_4 = arith.constant dense<0.000000e+00> : vector<512x128xf32>
    %7 = tpu.matmul %4, %6, %cst_4 {dimension_numbers = #tpu.dot_dimension_numbers<[1], [0], [0], [1], [0, 0, 1, 1], [], []>} : vector<512x4xf32>, vector<4x128xf32>, vector<512x128xf32> -> vector<512x128xf32>
    %c0_5 = arith.constant 0 : index
    %c0_6 = arith.constant 0 : index
    %8 = vector.load %arg3[%c0_5, %c0_6] : memref<4x128xf32, #tpu.memory_space<vmem>>, vector<4x128xf32>
    %cst_7 = arith.constant dense<0.000000e+00> : vector<512x128xf32>
    %9 = tpu.matmul %5, %8, %cst_7 {dimension_numbers = #tpu.dot_dimension_numbers<[1], [0], [0], [1], [0, 0, 1, 1], [], []>} : vector<512x4xf32>, vector<4x128xf32>, vector<512x128xf32> -> vector<512x128xf32>
    %10 = arith.addf %7, %9 : vector<512x128xf32>
    %c0_8 = arith.constant 0 : index
    %c0_9 = arith.constant 0 : index
    %11 = vector.load %arg4[%c0_8, %c0_9] : memref<1x128xf32, #tpu.memory_space<vmem>>, vector<1x128xf32>
    %12 = vector.broadcast %11 : vector<1x128xf32> to vector<512x128xf32>
    %13 = arith.addf %10, %12 : vector<512x128xf32>
    %14 = vector.shape_cast %13 : vector<512x128xf32> to vector<32x16x128xf32>
    %c0_10 = arith.constant 0 : index
    %c0_11 = arith.constant 0 : index
    %c0_12 = arith.constant 0 : index
    %15 = vector.load %arg5[%c0_10, %c0_11, %c0_12] : memref<32x16x128xf32, #tpu.memory_space<vmem>>, vector<32x16x128xf32>
    tpu.vector_store %arg5[%c0_10, %c0_11, %c0_12], %14 {strides = array<i32>} : memref<32x16x128xf32, #tpu.memory_space<vmem>>, vector<32x16x128xf32>,
    return
  }
  func.func @transform_0(%arg0: i32) -> (i32, i32, i32) {
    %c0_i32 = arith.constant 0 : i32
    %c0_i32_0 = arith.constant 0 : i32
    %c0_i32_1 = arith.constant 0 : i32
    return %arg0, %c0_i32, %c0_i32_0 : i32, i32, i32
  }
  func.func @transform_1(%arg0: i32) -> (i32, i32) {
    %c0_i32 = arith.constant 0 : i32
    %c0_i32_0 = arith.constant 0 : i32
    %c0_i32_1 = arith.constant 0 : i32
    return %c0_i32, %c0_i32_0 : i32, i32
  }
  func.func @transform_2(%arg0: i32) -> (i32, i32) {
    %c0_i32 = arith.constant 0 : i32
    %c0_i32_0 = arith.constant 0 : i32
    %c0_i32_1 = arith.constant 0 : i32
    return %c0_i32, %c0_i32_0 : i32, i32
  }
  func.func @transform_3(%arg0: i32) -> (i32, i32) {
    %c0_i32 = arith.constant 0 : i32
    %c0_i32_0 = arith.constant 0 : i32
    %c0_i32_1 = arith.constant 0 : i32
    return %c0_i32, %c0_i32_0 : i32, i32
  }
  func.func @transform_4(%arg0: i32) -> (i32, i32, i32) {
    %c0_i32 = arith.constant 0 : i32
    %c0_i32_0 = arith.constant 0 : i32
    %c0_i32_1 = arith.constant 0 : i32
    return %arg0, %c0_i32, %c0_i32_0 : i32, i32, i32
  }
}

</mosaic_0001>

<bundles_post_ra>
// kernel: tpu_custom_call.1
= control target key start
LH: loop header
LB: loop body
LE: loop exit
PB: predicated region body
PF: predicated region fallthrough
CT: control target
= control target key end

     0   :  { %vm470_vm0 = vcmask 1043456   ;;  %vm146_vm1 = vcmask 1046528   ;;  %vm309_vm2 = vcmask 31744   ;;  %s1829_s0 = inlined_call_operand.vmem [shape: f32[32,16,4], index: 0, kind: input, shape index: {}]   ;;  %s1830_s1 = inlined_call_operand.vmem [shape: f32[4,128], index: 1, kind: input, shape index: {}]   ;;  %s1831_s2 = inlined_call_operand.vmem [shape: f32[4,128], index: 2, kind: input, shape index: {}]   ;;  %s1832_s3 = inlined_call_operand.vmem [shape: f32[1,128], index: 3, kind: input, shape index: {}]   ;;  %s1833_s4 = inlined_call_operand.hbm [shape: f32[32,16,128], index: 4, kind: output, shape index: {}]  }
   0x1   :  { %v308_v0 = vld [vmem:[%s1831_s2] sm:$0xf]  ;;  %v51_v3 = vld [vmem:[%s1829_s0 + $0x108] sm:$0xff] }
   0x2   :  { %v307_v1 = vld [vmem:[%s1830_s1] sm:$0xf]  ;;  %1303 = vmatpush.msk.msra.mxu2 %vm470_vm0, %v308_v0  ;;  %v19_v6 = vld [vmem:[%s1829_s0 + $0x8] sm:$0xff]  ;;  %v196_v7 = vrot.slane %v51_v3, 1  ;;  %1173 = vmatpush.msk.msra.mxu0 %vm470_vm0, %v308_v0 }
   0x3   :  { %v50_v2 = vld [vmem:[%s1829_s0 + $0x100] sm:$0xff]  ;;  %1304 = vmatpush.msk.msra.mxu3 %vm470_vm0, %v307_v1  ;;  %v148_v9 = vrot.slane %v19_v6, 1  ;;  %1238 = vmatpush.msk.msra.mxu1 %vm470_vm0, %v307_v1 }
   0x4   :  { %v195_v4 = vrot.slane %v50_v2, 1  ;;  %v18_v5 = vld [vmem:[%s1829_s0] sm:$0xff]  ;;  %1271 = vmatmul.msk.f32.vlgmr.msra.gmra.mxu3 %vm309_vm2, %v50_v2 }
   0x5   :  { %v147_v8 = vrot.slane %v18_v5, 1  ;;  %1239 = vmatmul.msk.f32.vlgmr.msra.gmra.mxu1 %vm309_vm2, %v18_v5 }
   0x6   :  { %v197_v10 = vsel %vm146_vm1, %v195_v4, %v196_v7 }
   0x7   :  { %v149_v11 = vsel %vm146_vm1, %v147_v8, %v148_v9 }
   0x8   :  { %9 = vsyncpa [#allocation3], 0  ;;  %1206 = vmatmul.msk.f32.vlgmr.msra.gmra.mxu2 %vm309_vm2, %v197_v10  ;;  %1174 = vmatmul.msk.f32.vlgmr.msra.gmra.mxu0 %vm309_vm2, %v149_v11  ;;  %v291_v12 = vsel %vm146_vm1, %v196_v7, 0.0  ;;  %v275_v13 = vsel %vm146_vm1, %v148_v9, 0.0  ;;  %v52_v14 = vld [vmem:[%s1829_s0 + $0x110] sm:$0xff]  ;;  %v53_v15 = vld [vmem:[%s1829_s0 + $0x118] sm:$0xff] }
   0x9   :  { %v20_v16 = vld [vmem:[%s1829_s0 + $0x10] sm:$0xff]  ;;  %v21_v17 = vld [vmem:[%s1829_s0 + $0x18] sm:$0xff]  ;;  %v198_v18 = vrot.slane %v52_v14, 1  ;;  %v199_v19 = vrot.slane %v53_v15, 1  ;;  %v54_v26 = vld [vmem:[%s1829_s0 + $0x120] sm:$0xff]  ;;  %s1161_s9 = sshll.u32 %s1833_s4, 4  ;;  %s1162_s9 = int_to_ptr.hbm [resolvable:$true] %s1161_s9 }
   0xa   :  { %v150_v20 = vrot.slane %v20_v16, 1  ;;  %v151_v21 = vrot.slane %v21_v17, 1  ;;  %v55_v27 = vld [vmem:[%s1829_s0 + $0x128] sm:$0xff]  ;;  %v22_v28 = vld [vmem:[%s1829_s0 + $0x20] sm:$0xff]  ;;  %v201_v30 = vrot.slane %v54_v26, 1  ;;  %v56_v38 = vld [vmem:[%s1829_s0 + $0x130] sm:$0xff] }
   0xb   :  { %v200_v22 = vsel %vm146_vm1, %v198_v18, %v199_v19  ;;  %v292_v24 = vsel %vm146_vm1, %v199_v19, 0.0  ;;  %v23_v29 = vld [vmem:[%s1829_s0 + $0x28] sm:$0xff]  ;;  %v202_v31 = vrot.slane %v55_v27, 1  ;;  %v153_v32 = vrot.slane %v22_v28, 1  ;;  %v57_v39 = vld [vmem:[%s1829_s0 + $0x138] sm:$0xff]  ;;  %v24_v40 = vld [vmem:[%s1829_s0 + $0x30] sm:$0xff] }
   0xc   :  { %1272 = vmatmul.msk.f32.gmra.mxu3 %vm309_vm2, %v51_v3  ;;  %v152_v23 = vsel %vm146_vm1, %v150_v20, %v151_v21  ;;  %v276_v25 = vsel %vm146_vm1, %v151_v21, 0.0  ;;  %v154_v33 = vrot.slane %v23_v29, 1  ;;  %v25_v41 = vld [vmem:[%s1829_s0 + $0x38] sm:$0xff]  ;;  %v204_v42 = vrot.slane %v56_v38, 1  ;;  %v58_v50 = vld [vmem:[%s1829_s0 + $0x140] sm:$0xff]  ;;  %v59_v51 = vld [vmem:[%s1829_s0 + $0x148] sm:$0xff] }
   0xd   :  { %1240 = vmatmul.msk.f32.gmra.mxu1 %vm309_vm2, %v19_v6  ;;  %v203_v34 = vsel %vm146_vm1, %v201_v30, %v202_v31  ;;  %v293_v36 = vsel %vm146_vm1, %v202_v31, 0.0  ;;  %v205_v43 = vrot.slane %v57_v39, 1  ;;  %v156_v44 = vrot.slane %v24_v40, 1  ;;  %v26_v52 = vld [vmem:[%s1829_s0 + $0x40] sm:$0xff]  ;;  %v27_v53 = vld [vmem:[%s1829_s0 + $0x48] sm:$0xff]  ;;  %v60_v62 = vld [vmem:[%s1829_s0 + $0x150] sm:$0xff] }
   0xe   :  { %v155_v35 = vsel %vm146_vm1, %v153_v32, %v154_v33  ;;  %v277_v37 = vsel %vm146_vm1, %v154_v33, 0.0  ;;  %v157_v45 = vrot.slane %v25_v41, 1  ;;  %v207_v54 = vrot.slane %v58_v50, 1  ;;  %v61_v63 = vld [vmem:[%s1829_s0 + $0x158] sm:$0xff]  ;;  %v28_v0 = vld [vmem:[%s1829_s0 + $0x50] sm:$0xff]  ;;  %v62_v10 = vld [vmem:[%s1829_s0 + $0x160] sm:$0xff] }
   0xf   :  { %v206_v46 = vsel %vm146_vm1, %v204_v42, %v205_v43  ;;  %v294_v48 = vsel %vm146_vm1, %v205_v43, 0.0  ;;  %v208_v55 = vrot.slane %v59_v51, 1  ;;  %v159_v56 = vrot.slane %v26_v52, 1  ;;  %v29_v1 = vld [vmem:[%s1829_s0 + $0x58] sm:$0xff]  ;;  %v63_v11 = vld [vmem:[%s1829_s0 + $0x168] sm:$0xff]  ;;  %s1336_s10 = smov 128  }
  0x10   :  { %1207 = vmatmul.msk.f32.gmra.mxu2 %vm309_vm2, %v291_v12  ;;  %1175 = vmatmul.msk.f32.gmra.mxu0 %vm309_vm2, %v275_v13  ;;  %v158_v47 = vsel %vm146_vm1, %v156_v44, %v157_v45  ;;  %v278_v49 = vsel %vm146_vm1, %v157_v45, 0.0  ;;  %v160_v57 = vrot.slane %v27_v53, 1  ;;  %v210_v2 = vrot.slane %v60_v62, 1  ;;  %v30_v12 = vld [vmem:[%s1829_s0 + $0x60] sm:$0xff]  ;;  %v31_v13 = vld [vmem:[%s1829_s0 + $0x68] sm:$0xff]  ;;  %s1337_s11 = smov 8  }
  0x11   :  { %v209_v58 = vsel %vm146_vm1, %v207_v54, %v208_v55  ;;  %v295_v60 = vsel %vm146_vm1, %v208_v55, 0.0  ;;  %v211_v3 = vrot.slane %v61_v63, 1  ;;  %v162_v4 = vrot.slane %v28_v0, 1  ;;  %v1580_v43 = vld [vmem:[%s1832_s3] ss:$0 sm:$0xff] }
  0x12   :  { %v161_v59 = vsel %vm146_vm1, %v159_v56, %v160_v57  ;;  %v279_v61 = vsel %vm146_vm1, %v160_v57, 0.0  ;;  %v163_v5 = vrot.slane %v29_v1, 1  ;;  %v68_v56 = vld [vmem:[%s1829_s0 + $0x190] sm:$0xff] }
  0x13   :  { %v212_v6 = vsel %vm146_vm1, %v210_v2, %v211_v3  ;;  %v296_v8 = vsel %vm146_vm1, %v211_v3, 0.0 }
  0x14   :  { %1273 = vmatmul.msk.f32.gmra.mxu3 %vm309_vm2, %v52_v14  ;;  %v164_v7 = vsel %vm146_vm1, %v162_v4, %v163_v5  ;;  %v280_v9 = vsel %vm146_vm1, %v163_v5, 0.0  ;;  %v213_v14 = vrot.slane %v62_v10, 1 }
  0x15   :  { %1241 = vmatmul.msk.f32.gmra.mxu1 %vm309_vm2, %v20_v16  ;;  %v165_v16 = vrot.slane %v30_v12, 1 }
  0x18   :  { %1208 = vmatmul.msk.f32.gmra.mxu2 %vm309_vm2, %v200_v22  ;;  %1176 = vmatmul.msk.f32.gmra.mxu0 %vm309_vm2, %v152_v23  ;;  %v64_v22 = vld [vmem:[%s1829_s0 + $0x170] sm:$0xff]  ;;  %v65_v23 = vld [vmem:[%s1829_s0 + $0x178] sm:$0xff] }
  0x1c   :  { %1274 = vmatmul.msk.f32.gmra.mxu3 %vm309_vm2, %v53_v15  ;;  %v214_v15 = vrot.slane %v63_v11, 1 }
  0x1d   :  { %1242 = vmatmul.msk.f32.gmra.mxu1 %vm309_vm2, %v21_v17  ;;  %v166_v17 = vrot.slane %v31_v13, 1 }
  0x1e   :  { %v215_v18 = vsel %vm146_vm1, %v213_v14, %v214_v15  ;;  %v297_v20 = vsel %vm146_vm1, %v214_v15, 0.0 }
  0x1f   :  { %v167_v19 = vsel %vm146_vm1, %v165_v16, %v166_v17  ;;  %v281_v21 = vsel %vm146_vm1, %v166_v17, 0.0 }
  0x20   :  { %1209 = vmatmul.msk.f32.gmra.mxu2 %vm309_vm2, %v292_v24  ;;  %1177 = vmatmul.msk.f32.gmra.mxu0 %vm309_vm2, %v276_v25  ;;  %v32_v24 = vld [vmem:[%s1829_s0 + $0x70] sm:$0xff]  ;;  %v33_v25 = vld [vmem:[%s1829_s0 + $0x78] sm:$0xff] }
  0x24   :  { %1275 = vmatmul.msk.f32.gmra.mxu3 %vm309_vm2, %v54_v26  ;;  %v216_v26 = vrot.slane %v64_v22, 1 }
  0x25   :  { %1243 = vmatmul.msk.f32.gmra.mxu1 %vm309_vm2, %v22_v28  ;;  %v168_v28 = vrot.slane %v32_v24, 1 }
  0x28   :  { %1210 = vmatmul.msk.f32.gmra.mxu2 %vm309_vm2, %v203_v34  ;;  %1178 = vmatmul.msk.f32.gmra.mxu0 %vm309_vm2, %v155_v35  ;;  %v66_v34 = vld [vmem:[%s1829_s0 + $0x180] sm:$0xff]  ;;  %v67_v35 = vld [vmem:[%s1829_s0 + $0x188] sm:$0xff] }
  0x2c   :  { %1276 = vmatmul.msk.f32.gmra.mxu3 %vm309_vm2, %v55_v27  ;;  %v217_v27 = vrot.slane %v65_v23, 1 }
  0x2d   :  { %1244 = vmatmul.msk.f32.gmra.mxu1 %vm309_vm2, %v23_v29  ;;  %v169_v29 = vrot.slane %v33_v25, 1 }
  0x2e   :  { %v218_v30 = vsel %vm146_vm1, %v216_v26, %v217_v27  ;;  %v298_v32 = vsel %vm146_vm1, %v217_v27, 0.0 }
  0x2f   :  { %v170_v31 = vsel %vm146_vm1, %v168_v28, %v169_v29  ;;  %v282_v33 = vsel %vm146_vm1, %v169_v29, 0.0 }
  0x30   :  { %1211 = vmatmul.msk.f32.gmra.mxu2 %vm309_vm2, %v293_v36  ;;  %1179 = vmatmul.msk.f32.gmra.mxu0 %vm309_vm2, %v277_v37  ;;  %v34_v36 = vld [vmem:[%s1829_s0 + $0x80] sm:$0xff]  ;;  %v35_v37 = vld [vmem:[%s1829_s0 + $0x88] sm:$0xff] }
  0x34   :  { %1277 = vmatmul.msk.f32.gmra.mxu3 %vm309_vm2, %v56_v38  ;;  %v219_v38 = vrot.slane %v66_v34, 1 }
  0x35   :  { %1245 = vmatmul.msk.f32.gmra.mxu1 %vm309_vm2, %v24_v40  ;;  %v171_v40 = vrot.slane %v34_v36, 1 }
  0x38   :  { %1212 = vmatmul.msk.f32.gmra.mxu2 %vm309_vm2, %v206_v46  ;;  %1180 = vmatmul.msk.f32.gmra.mxu0 %vm309_vm2, %v158_v47 }
  0x3c   :  { %1278 = vmatmul.msk.f32.gmra.mxu3 %vm309_vm2, %v57_v39  ;;  %v220_v39 = vrot.slane %v67_v35, 1 }
  0x3d   :  { %1246 = vmatmul.msk.f32.gmra.mxu1 %vm309_vm2, %v25_v41  ;;  %v172_v41 = vrot.slane %v35_v37, 1 }
  0x3e   :  { %v221_v44 = vsel %vm146_vm1, %v219_v38, %v220_v39 }
  0x3f   :  { %v173_v46 = vsel %vm146_vm1, %v171_v40, %v172_v41  ;;  %v283_v55 = vsel %vm146_vm1, %v172_v41, 0.0 }
  0x40   :  { %1213 = vmatmul.msk.f32.gmra.mxu2 %vm309_vm2, %v294_v48  ;;  %1181 = vmatmul.msk.f32.gmra.mxu0 %vm309_vm2, %v278_v49 }
  0x44   :  { %1279 = vmatmul.msk.f32.gmra.mxu3 %vm309_vm2, %v58_v50 }
  0x45   :  { %1247 = vmatmul.msk.f32.gmra.mxu1 %vm309_vm2, %v26_v52 }
  0x48   :  { %1214 = vmatmul.msk.f32.gmra.mxu2 %vm309_vm2, %v209_v58  ;;  %1182 = vmatmul.msk.f32.gmra.mxu0 %vm309_vm2, %v161_v59  ;;  %v69_v59 = vld [vmem:[%s1829_s0 + $0x198] sm:$0xff] }
  0x4c   :  { %1280 = vmatmul.msk.f32.gmra.mxu3 %vm309_vm2, %v59_v51 }
  0x4d   :  { %1248 = vmatmul.msk.f32.gmra.mxu1 %vm309_vm2, %v27_v53  ;;  %v299_v53 = vsel %vm146_vm1, %v220_v39, 0.0 }
  0x50   :  { %1215 = vmatmul.msk.f32.gmra.mxu2 %vm309_vm2, %v295_v60  ;;  %1183 = vmatmul.msk.f32.gmra.mxu0 %vm309_vm2, %v279_v61  ;;  %v36_v60 = vld [vmem:[%s1829_s0 + $0x90] sm:$0xff]  ;;  %v37_v61 = vld [vmem:[%s1829_s0 + $0x98] sm:$0xff] }
  0x51   :  { %v174_v2 = vrot.slane %v36_v60, 1  ;;  %v175_v3 = vrot.slane %v37_v61, 1 }
  0x54   :  { %1281 = vmatmul.msk.f32.gmra.mxu3 %vm309_vm2, %v60_v62 }
  0x55   :  { %1249 = vmatmul.msk.f32.gmra.mxu1 %vm309_vm2, %v28_v0  ;;  %v222_v0 = vrot.slane %v68_v56, 1 }
  0x58   :  { %1216 = vmatmul.msk.f32.gmra.mxu2 %vm309_vm2, %v212_v6  ;;  %1184 = vmatmul.msk.f32.gmra.mxu0 %vm309_vm2, %v164_v7 }
  0x5c   :  { %1282 = vmatmul.msk.f32.gmra.mxu3 %vm309_vm2, %v61_v63 }
  0x5d   :  { %1250 = vmatmul.msk.f32.gmra.mxu1 %vm309_vm2, %v29_v1  ;;  %v223_v1 = vrot.slane %v69_v59, 1 }
  0x5f   :  { %v224_v7 = vsel %vm146_vm1, %v222_v0, %v223_v1  ;;  %v300_v17 = vsel %vm146_vm1, %v223_v1, 0.0 }
  0x60   :  { %1217 = vmatmul.msk.f32.gmra.mxu2 %vm309_vm2, %v296_v8  ;;  %1185 = vmatmul.msk.f32.gmra.mxu0 %vm309_vm2, %v280_v9  ;;  %v176_v9 = vsel %vm146_vm1, %v174_v2, %v175_v3 }
  0x64   :  { %1283 = vmatmul.msk.f32.gmra.mxu3 %vm309_vm2, %v62_v10 }
  0x65   :  { %1251 = vmatmul.msk.f32.gmra.mxu1 %vm309_vm2, %v30_v12 }
  0x68   :  { %1218 = vmatmul.msk.f32.gmra.mxu2 %vm309_vm2, %v215_v18  ;;  %1186 = vmatmul.msk.f32.gmra.mxu0 %vm309_vm2, %v167_v19  ;;  %v284_v19 = vsel %vm146_vm1, %v175_v3, 0.0 }
  0x6c   :  { %1284 = vmatmul.msk.f32.gmra.mxu3 %vm309_vm2, %v63_v11 }
  0x6d   :  { %1252 = vmatmul.msk.f32.gmra.mxu1 %vm309_vm2, %v31_v13 }
  0x70   :  { %1219 = vmatmul.msk.f32.gmra.mxu2 %vm309_vm2, %v297_v20  ;;  %1187 = vmatmul.msk.f32.gmra.mxu0 %vm309_vm2, %v281_v21  ;;  %v70_v20 = vld [vmem:[%s1829_s0 + $0x1a0] sm:$0xff] }
  0x71   :  { %v225_v28 = vrot.slane %v70_v20, 1 }
  0x74   :  { %1285 = vmatmul.msk.f32.gmra.mxu3 %vm309_vm2, %v64_v22 }
  0x75   :  { %1253 = vmatmul.msk.f32.gmra.mxu1 %vm309_vm2, %v32_v24  ;;  %v38_v24 = vld [vmem:[%s1829_s0 + $0xa0] sm:$0xff] }
  0x78   :  { %1220 = vmatmul.msk.f32.gmra.mxu2 %vm309_vm2, %v218_v30  ;;  %1188 = vmatmul.msk.f32.gmra.mxu0 %vm309_vm2, %v170_v31  ;;  %v177_v30 = vrot.slane %v38_v24, 1 }
  0x7c   :  { %1286 = vmatmul.msk.f32.gmra.mxu3 %vm309_vm2, %v65_v23  ;;  %v71_v23 = vld [vmem:[%s1829_s0 + $0x1a8] sm:$0xff] }
  0x7d   :  { %1254 = vmatmul.msk.f32.gmra.mxu1 %vm309_vm2, %v33_v25  ;;  %v39_v25 = vld [vmem:[%s1829_s0 + $0xa8] sm:$0xff]  ;;  %v226_v29 = vrot.slane %v71_v23, 1 }
  0x7e   :  { %v178_v31 = vrot.slane %v39_v25, 1 }
  0x80   :  { %1221 = vmatmul.msk.f32.gmra.mxu2 %vm309_vm2, %v298_v32  ;;  %1189 = vmatmul.msk.f32.gmra.mxu0 %vm309_vm2, %v282_v33 }
  0x82   :  { %v831_v42 = vpop.f32.mrf.mxu1 }
  0x84   :  { %1287 = vmatmul.msk.f32.gmra.mxu3 %vm309_vm2, %v66_v34 }
  0x85   :  { %v491_v45 = vpop.f32.mrf.mxu0  ;;  %1255 = vmatmul.msk.f32.gmra.mxu1 %vm309_vm2, %v34_v36 }
  0x86   :  { %v832_v47 = vadd.f32 %v831_v42, %v491_v45 }
  0x87   :  { %v927_v49 = vpop.f32.mrf.mxu3 }
  0x88   :  { %1222 = vmatmul.msk.f32.gmra.mxu2 %vm309_vm2, %v221_v44  ;;  %v1027_v48 = vadd.f32 %v1580_v43, %v832_v47  ;;  %1190 = vmatmul.msk.f32.gmra.mxu0 %vm309_vm2, %v173_v46  ;;  %v301_v46 = vsel %vm146_vm1, %v226_v29, 0.0 }
  0x8a   :  { %1091 = vst [vmem:[#allocation2] sm:$0xff] %v1027_v48  ;;  %v834_v52 = vpop.f32.mrf.mxu1  ;;  %v285_v48 = vsel %vm146_vm1, %v178_v31, 0.0 }
  0x8b   :  { %v587_v50 = vpop.f32.mrf.mxu2 }
  0x8c   :  { %v928_v51 = vadd.f32 %v927_v49, %v587_v50  ;;  %1288 = vmatmul.msk.f32.gmra.mxu3 %vm309_vm2, %v67_v35  ;;  %v227_v35 = vsel %vm146_vm1, %v225_v28, %v226_v29  ;;  %v72_v49 = vld [vmem:[%s1829_s0 + $0x1b0] sm:$0xff] }
  0x8d   :  { %v494_v54 = vpop.f32.mrf.mxu0  ;;  %1256 = vmatmul.msk.f32.gmra.mxu1 %vm309_vm2, %v35_v37  ;;  %v179_v37 = vsel %vm146_vm1, %v177_v30, %v178_v31 }
  0x8e   :  { %v1059_v57 = vadd.f32 %v1580_v43, %v928_v51  ;;  %v835_v58 = vadd.f32 %v834_v52, %v494_v54  ;;  %v73_v52 = vld [vmem:[%s1829_s0 + $0x1b8] sm:$0xff] }
  0x8f   :  { %v930_v63 = vpop.f32.mrf.mxu3  ;;  %v41_v54 = vld [vmem:[%s1829_s0 + $0xb8] sm:$0xff] }
  0x90   :  { %1123 = vst [vmem:[#allocation2 + $0x100] sm:$0xff] %v1059_v57  ;;  %1223 = vmatmul.msk.f32.gmra.mxu2 %vm309_vm2, %v299_v53  ;;  %v1028_v62 = vadd.f32 %v1580_v43, %v835_v58  ;;  %1191 = vmatmul.msk.f32.gmra.mxu0 %vm309_vm2, %v283_v55  ;;  %v40_v53 = vld [vmem:[%s1829_s0 + $0xb0] sm:$0xff]  ;;  %v228_v57 = vrot.slane %v72_v49, 1  ;;  %v229_v58 = vrot.slane %v73_v52, 1 }
  0x92   :  { %1092 = vst [vmem:[#allocation2 + $0x8] sm:$0xff] %v1028_v62  ;;  %v837_v6 = vpop.f32.mrf.mxu1  ;;  %v230_v0 = vsel %vm146_vm1, %v228_v57, %v229_v58 }
  0x93   :  { %v590_v4 = vpop.f32.mrf.mxu2 }
  0x94   :  { %v931_v5 = vadd.f32 %v930_v63, %v590_v4  ;;  %1289 = vmatmul.msk.f32.gmra.mxu3 %vm309_vm2, %v68_v56 }
  0x95   :  { %v497_v8 = vpop.f32.mrf.mxu0  ;;  %1257 = vmatmul.msk.f32.gmra.mxu1 %vm309_vm2, %v36_v60  ;;  %v181_v60 = vrot.slane %v41_v54, 1 }
  0x96   :  { %v1060_v10 = vadd.f32 %v1580_v43, %v931_v5  ;;  %v838_v11 = vadd.f32 %v837_v6, %v497_v8 }
  0x97   :  { %v933_v13 = vpop.f32.mrf.mxu3 }
  0x98   :  { %1124 = vst [vmem:[#allocation2 + $0x108] sm:$0xff] %v1060_v10  ;;  %1224 = vmatmul.msk.f32.gmra.mxu2 %vm309_vm2, %v224_v7  ;;  %v1029_v12 = vadd.f32 %v1580_v43, %v838_v11  ;;  %1192 = vmatmul.msk.f32.gmra.mxu0 %vm309_vm2, %v176_v9  ;;  %v302_v10 = vsel %vm146_vm1, %v229_v58, 0.0 }
  0x9a   :  { %1093 = vst [vmem:[#allocation2 + $0x10] sm:$0xff] %v1029_v12  ;;  %v840_v16 = vpop.f32.mrf.mxu1  ;;  %v286_v12 = vsel %vm146_vm1, %v181_v60, 0.0 }
  0x9b   :  { %v593_v14 = vpop.f32.mrf.mxu2 }
  0x9c   :  { %v934_v15 = vadd.f32 %v933_v13, %v593_v14  ;;  %1290 = vmatmul.msk.f32.gmra.mxu3 %vm309_vm2, %v69_v59  ;;  %v180_v59 = vrot.slane %v40_v53, 1  ;;  %v74_v13 = vld [vmem:[%s1829_s0 + $0x1c0] sm:$0xff] }
  0x9d   :  { %v500_v18 = vpop.f32.mrf.mxu0  ;;  %1258 = vmatmul.msk.f32.gmra.mxu1 %vm309_vm2, %v37_v61 }
  0x9e   :  { %v1061_v21 = vadd.f32 %v1580_v43, %v934_v15  ;;  %v841_v22 = vadd.f32 %v840_v16, %v500_v18  ;;  %v182_v2 = vsel %vm146_vm1, %v180_v59, %v181_v60  ;;  %v75_v16 = vld [vmem:[%s1829_s0 + $0x1c8] sm:$0xff] }
  0x9f   :  { %v936_v27 = vpop.f32.mrf.mxu3  ;;  %v43_v18 = vld [vmem:[%s1829_s0 + $0xc8] sm:$0xff] }
  0xa0   :  { %1125 = vst [vmem:[#allocation2 + $0x110] sm:$0xff] %v1061_v21  ;;  %1225 = vmatmul.msk.f32.gmra.mxu2 %vm309_vm2, %v300_v17  ;;  %v1030_v26 = vadd.f32 %v1580_v43, %v841_v22  ;;  %1193 = vmatmul.msk.f32.gmra.mxu0 %vm309_vm2, %v284_v19  ;;  %v42_v17 = vld [vmem:[%s1829_s0 + $0xc0] sm:$0xff]  ;;  %v231_v21 = vrot.slane %v74_v13, 1  ;;  %v232_v22 = vrot.slane %v75_v16, 1 }
  0xa2   :  { %1094 = vst [vmem:[#allocation2 + $0x18] sm:$0xff] %v1030_v26  ;;  %v843_v34 = vpop.f32.mrf.mxu1  ;;  %v233_v28 = vsel %vm146_vm1, %v231_v21, %v232_v22 }
  0xa3   :  { %v596_v32 = vpop.f32.mrf.mxu2 }
  0xa4   :  { %v937_v33 = vadd.f32 %v936_v27, %v596_v32  ;;  %1291 = vmatmul.msk.f32.gmra.mxu3 %vm309_vm2, %v70_v20 }
  0xa5   :  { %v503_v36 = vpop.f32.mrf.mxu0  ;;  %1259 = vmatmul.msk.f32.gmra.mxu1 %vm309_vm2, %v38_v24  ;;  %v184_v24 = vrot.slane %v43_v18, 1 }
  0xa6   :  { %v1062_v38 = vadd.f32 %v1580_v43, %v937_v33  ;;  %v844_v39 = vadd.f32 %v843_v34, %v503_v36 }
  0xa7   :  { %v939_v41 = vpop.f32.mrf.mxu3 }
  0xa8   :  { %1126 = vst [vmem:[#allocation2 + $0x118] sm:$0xff] %v1062_v38  ;;  %1226 = vmatmul.msk.f32.gmra.mxu2 %vm309_vm2, %v227_v35  ;;  %v1031_v40 = vadd.f32 %v1580_v43, %v844_v39  ;;  %1194 = vmatmul.msk.f32.gmra.mxu0 %vm309_vm2, %v179_v37  ;;  %v303_v38 = vsel %vm146_vm1, %v232_v22, 0.0 }
  0xaa   :  { %1095 = vst [vmem:[#allocation2 + $0x20] sm:$0xff] %v1031_v40  ;;  %v846_v45 = vpop.f32.mrf.mxu1  ;;  %v287_v40 = vsel %vm146_vm1, %v184_v24, 0.0 }
  0xab   :  { %v599_v42 = vpop.f32.mrf.mxu2 }
  0xac   :  { %v940_v44 = vadd.f32 %v939_v41, %v599_v42  ;;  %1292 = vmatmul.msk.f32.gmra.mxu3 %vm309_vm2, %v71_v23  ;;  %v183_v23 = vrot.slane %v42_v17, 1  ;;  %v76_v41 = vld [vmem:[%s1829_s0 + $0x1d0] sm:$0xff] }
  0xad   :  { %v506_v47 = vpop.f32.mrf.mxu0  ;;  %1260 = vmatmul.msk.f32.gmra.mxu1 %vm309_vm2, %v39_v25 }
  0xae   :  { %v1063_v50 = vadd.f32 %v1580_v43, %v940_v44  ;;  %v847_v51 = vadd.f32 %v846_v45, %v506_v47  ;;  %v185_v30 = vsel %vm146_vm1, %v183_v23, %v184_v24  ;;  %v77_v45 = vld [vmem:[%s1829_s0 + $0x1d8] sm:$0xff] }
  0xaf   :  { %v942_v56 = vpop.f32.mrf.mxu3  ;;  %v45_v47 = vld [vmem:[%s1829_s0 + $0xd8] sm:$0xff] }
  0xb0   :  { %1127 = vst [vmem:[#allocation2 + $0x120] sm:$0xff] %v1063_v50  ;;  %1227 = vmatmul.msk.f32.gmra.mxu2 %vm309_vm2, %v301_v46  ;;  %v1032_v55 = vadd.f32 %v1580_v43, %v847_v51  ;;  %1195 = vmatmul.msk.f32.gmra.mxu0 %vm309_vm2, %v285_v48  ;;  %v44_v46 = vld [vmem:[%s1829_s0 + $0xd0] sm:$0xff]  ;;  %v234_v50 = vrot.slane %v76_v41, 1  ;;  %v235_v51 = vrot.slane %v77_v45, 1 }
  0xb2   :  { %1096 = vst [vmem:[#allocation2 + $0x28] sm:$0xff] %v1032_v55  ;;  %v849_v63 = vpop.f32.mrf.mxu1  ;;  %v236_v57 = vsel %vm146_vm1, %v234_v50, %v235_v51 }
  0xb3   :  { %v602_v61 = vpop.f32.mrf.mxu2 }
  0xb4   :  { %v943_v62 = vadd.f32 %v942_v56, %v602_v61  ;;  %1293 = vmatmul.msk.f32.gmra.mxu3 %vm309_vm2, %v72_v49 }
  0xb5   :  { %v509_v1 = vpop.f32.mrf.mxu0  ;;  %1261 = vmatmul.msk.f32.gmra.mxu1 %vm309_vm2, %v40_v53  ;;  %v187_v53 = vrot.slane %v45_v47, 1 }
  0xb6   :  { %v1064_v3 = vadd.f32 %v1580_v43, %v943_v62  ;;  %v850_v4 = vadd.f32 %v849_v63, %v509_v1 }
  0xb7   :  { %v945_v6 = vpop.f32.mrf.mxu3 }
  0xb8   :  { %1128 = vst [vmem:[#allocation2 + $0x128] sm:$0xff] %v1064_v3  ;;  %1228 = vmatmul.msk.f32.gmra.mxu2 %vm309_vm2, %v230_v0  ;;  %v1033_v5 = vadd.f32 %v1580_v43, %v850_v4  ;;  %1196 = vmatmul.msk.f32.gmra.mxu0 %vm309_vm2, %v182_v2  ;;  %v304_v3 = vsel %vm146_vm1, %v235_v51, 0.0 }
  0xba   :  { %1097 = vst [vmem:[#allocation2 + $0x30] sm:$0xff] %v1033_v5  ;;  %v852_v9 = vpop.f32.mrf.mxu1  ;;  %v288_v5 = vsel %vm146_vm1, %v187_v53, 0.0 }
  0xbb   :  { %v605_v7 = vpop.f32.mrf.mxu2 }
  0xbc   :  { %v946_v8 = vadd.f32 %v945_v6, %v605_v7  ;;  %1294 = vmatmul.msk.f32.gmra.mxu3 %vm309_vm2, %v73_v52  ;;  %v186_v52 = vrot.slane %v44_v46, 1  ;;  %v78_v6 = vld [vmem:[%s1829_s0 + $0x1e0] sm:$0xff] }
  0xbd   :  { %v512_v11 = vpop.f32.mrf.mxu0  ;;  %1262 = vmatmul.msk.f32.gmra.mxu1 %vm309_vm2, %v41_v54 }
  0xbe   :  { %v1065_v14 = vadd.f32 %v1580_v43, %v946_v8  ;;  %v853_v15 = vadd.f32 %v852_v9, %v512_v11  ;;  %v188_v59 = vsel %vm146_vm1, %v186_v52, %v187_v53  ;;  %v79_v9 = vld [vmem:[%s1829_s0 + $0x1e8] sm:$0xff] }
  0xbf   :  { %v948_v20 = vpop.f32.mrf.mxu3  ;;  %v47_v11 = vld [vmem:[%s1829_s0 + $0xe8] sm:$0xff] }
  0xc0   :  { %1129 = vst [vmem:[#allocation2 + $0x130] sm:$0xff] %v1065_v14  ;;  %1229 = vmatmul.msk.f32.gmra.mxu2 %vm309_vm2, %v302_v10  ;;  %v1034_v19 = vadd.f32 %v1580_v43, %v853_v15  ;;  %1197 = vmatmul.msk.f32.gmra.mxu0 %vm309_vm2, %v286_v12  ;;  %v46_v10 = vld [vmem:[%s1829_s0 + $0xe0] sm:$0xff]  ;;  %v237_v14 = vrot.slane %v78_v6, 1  ;;  %v238_v15 = vrot.slane %v79_v9, 1 }
  0xc2   :  { %1098 = vst [vmem:[#allocation2 + $0x38] sm:$0xff] %v1034_v19  ;;  %v855_v27 = vpop.f32.mrf.mxu1  ;;  %v239_v21 = vsel %vm146_vm1, %v237_v14, %v238_v15 }
  0xc3   :  { %v608_v25 = vpop.f32.mrf.mxu2 }
  0xc4   :  { %v949_v26 = vadd.f32 %v948_v20, %v608_v25  ;;  %1295 = vmatmul.msk.f32.gmra.mxu3 %vm309_vm2, %v74_v13 }
  0xc5   :  { %v515_v29 = vpop.f32.mrf.mxu0  ;;  %1263 = vmatmul.msk.f32.gmra.mxu1 %vm309_vm2, %v42_v17  ;;  %v190_v17 = vrot.slane %v47_v11, 1 }
  0xc6   :  { %v1066_v31 = vadd.f32 %v1580_v43, %v949_v26  ;;  %v856_v32 = vadd.f32 %v855_v27, %v515_v29 }
  0xc7   :  { %v951_v34 = vpop.f32.mrf.mxu3 }
  0xc8   :  { %1130 = vst [vmem:[#allocation2 + $0x138] sm:$0xff] %v1066_v31  ;;  %1230 = vmatmul.msk.f32.gmra.mxu2 %vm309_vm2, %v233_v28  ;;  %v1035_v33 = vadd.f32 %v1580_v43, %v856_v32  ;;  %1198 = vmatmul.msk.f32.gmra.mxu0 %vm309_vm2, %v185_v30  ;;  %v305_v31 = vsel %vm146_vm1, %v238_v15, 0.0 }
  0xca   :  { %1099 = vst [vmem:[#allocation2 + $0x40] sm:$0xff] %v1035_v33  ;;  %v858_v37 = vpop.f32.mrf.mxu1  ;;  %v289_v33 = vsel %vm146_vm1, %v190_v17, 0.0 }
  0xcb   :  { %v611_v35 = vpop.f32.mrf.mxu2 }
  0xcc   :  { %v952_v36 = vadd.f32 %v951_v34, %v611_v35  ;;  %1296 = vmatmul.msk.f32.gmra.mxu3 %vm309_vm2, %v75_v16  ;;  %v189_v16 = vrot.slane %v46_v10, 1  ;;  %v80_v34 = vld [vmem:[%s1829_s0 + $0x1f0] sm:$0xff] }
  0xcd   :  { %v518_v39 = vpop.f32.mrf.mxu0  ;;  %1264 = vmatmul.msk.f32.gmra.mxu1 %vm309_vm2, %v43_v18 }
  0xce   :  { %v1067_v42 = vadd.f32 %v1580_v43, %v952_v36  ;;  %v859_v44 = vadd.f32 %v858_v37, %v518_v39  ;;  %v191_v23 = vsel %vm146_vm1, %v189_v16, %v190_v17  ;;  %v81_v37 = vld [vmem:[%s1829_s0 + $0x1f8] sm:$0xff] }
  0xcf   :  { %v954_v49 = vpop.f32.mrf.mxu3  ;;  %v49_v39 = vld [vmem:[%s1829_s0 + $0xf8] sm:$0xff] }
  0xd0   :  { %1131 = vst [vmem:[#allocation2 + $0x140] sm:$0xff] %v1067_v42  ;;  %1231 = vmatmul.msk.f32.gmra.mxu2 %vm309_vm2, %v303_v38  ;;  %v1036_v48 = vadd.f32 %v1580_v43, %v859_v44  ;;  %1199 = vmatmul.msk.f32.gmra.mxu0 %vm309_vm2, %v287_v40  ;;  %v48_v38 = vld [vmem:[%s1829_s0 + $0xf0] sm:$0xff]  ;;  %v240_v42 = vrot.slane %v80_v34, 1  ;;  %v241_v44 = vrot.slane %v81_v37, 1  ;;  %s1335_s0 = smov [#allocation2]  }
  0xd1   :  { %s1159_s7 = sshll.u32 %s1335_s0, 4  ;;  %s1160_s7 = int_to_ptr.vmem [resolvable:$true] %s1159_s7 }
  0xd2   :  { %1100 = vst [vmem:[#allocation2 + $0x48] sm:$0xff] %v1036_v48  ;;  %v861_v56 = vpop.f32.mrf.mxu1  ;;  %v242_v50 = vsel %vm146_vm1, %v240_v42, %v241_v44 }
  0xd3   :  { %v614_v54 = vpop.f32.mrf.mxu2 }
  0xd4   :  { %v955_v55 = vadd.f32 %v954_v49, %v614_v54  ;;  %1297 = vmatmul.msk.f32.gmra.mxu3 %vm309_vm2, %v76_v41 }
  0xd5   :  { %v521_v58 = vpop.f32.mrf.mxu0  ;;  %1265 = vmatmul.msk.f32.gmra.mxu1 %vm309_vm2, %v44_v46  ;;  %v193_v46 = vrot.slane %v49_v39, 1 }
  0xd6   :  { %v1068_v60 = vadd.f32 %v1580_v43, %v955_v55  ;;  %v862_v61 = vadd.f32 %v861_v56, %v521_v58 }
  0xd7   :  { %v957_v63 = vpop.f32.mrf.mxu3 }
  0xd8   :  { %1132 = vst [vmem:[#allocation2 + $0x148] sm:$0xff] %v1068_v60  ;;  %1232 = vmatmul.msk.f32.gmra.mxu2 %vm309_vm2, %v236_v57  ;;  %v1037_v62 = vadd.f32 %v1580_v43, %v862_v61  ;;  %1200 = vmatmul.msk.f32.gmra.mxu0 %vm309_vm2, %v188_v59  ;;  %v306_v60 = vsel %vm146_vm1, %v241_v44, 0.0 }
  0xda   :  { %1101 = vst [vmem:[#allocation2 + $0x50] sm:$0xff] %v1037_v62  ;;  %v864_v2 = vpop.f32.mrf.mxu1  ;;  %v290_v62 = vsel %vm146_vm1, %v193_v46, 0.0 }
  0xdb   :  { %v617_v0 = vpop.f32.mrf.mxu2 }
  0xdc   :  { %v958_v1 = vadd.f32 %v957_v63, %v617_v0  ;;  %1298 = vmatmul.msk.f32.gmra.mxu3 %vm309_vm2, %v77_v45  ;;  %v192_v45 = vrot.slane %v48_v38, 1 }
  0xdd   :  { %v524_v4 = vpop.f32.mrf.mxu0  ;;  %1266 = vmatmul.msk.f32.gmra.mxu1 %vm309_vm2, %v45_v47 }
  0xde   :  { %v1069_v7 = vadd.f32 %v1580_v43, %v958_v1  ;;  %v865_v8 = vadd.f32 %v864_v2, %v524_v4  ;;  %v194_v52 = vsel %vm146_vm1, %v192_v45, %v193_v46 }
  0xdf   :  { %v960_v13 = vpop.f32.mrf.mxu3 }
  0xe0   :  { %1133 = vst [vmem:[#allocation2 + $0x150] sm:$0xff] %v1069_v7  ;;  %1233 = vmatmul.msk.f32.gmra.mxu2 %vm309_vm2, %v304_v3  ;;  %v1038_v12 = vadd.f32 %v1580_v43, %v865_v8  ;;  %1201 = vmatmul.msk.f32.gmra.mxu0 %vm309_vm2, %v288_v5 }
  0xe2   :  { %1102 = vst [vmem:[#allocation2 + $0x58] sm:$0xff] %v1038_v12  ;;  %v867_v20 = vpop.f32.mrf.mxu1 }
  0xe3   :  { %v620_v18 = vpop.f32.mrf.mxu2 }
  0xe4   :  { %v961_v19 = vadd.f32 %v960_v13, %v620_v18  ;;  %1299 = vmatmul.msk.f32.gmra.mxu3 %vm309_vm2, %v78_v6 }
  0xe5   :  { %v527_v22 = vpop.f32.mrf.mxu0  ;;  %1267 = vmatmul.msk.f32.gmra.mxu1 %vm309_vm2, %v46_v10 }
  0xe6   :  { %v1070_v24 = vadd.f32 %v1580_v43, %v961_v19  ;;  %v868_v25 = vadd.f32 %v867_v20, %v527_v22 }
  0xe7   :  { %v963_v27 = vpop.f32.mrf.mxu3 }
  0xe8   :  { %1134 = vst [vmem:[#allocation2 + $0x158] sm:$0xff] %v1070_v24  ;;  %1234 = vmatmul.msk.f32.gmra.mxu2 %vm309_vm2, %v239_v21  ;;  %v1039_v26 = vadd.f32 %v1580_v43, %v868_v25  ;;  %1202 = vmatmul.msk.f32.gmra.mxu0 %vm309_vm2, %v191_v23 }
  0xea   :  { %1103 = vst [vmem:[#allocation2 + $0x60] sm:$0xff] %v1039_v26  ;;  %v870_v30 = vpop.f32.mrf.mxu1 }
  0xeb   :  { %v623_v28 = vpop.f32.mrf.mxu2 }
  0xec   :  { %v964_v29 = vadd.f32 %v963_v27, %v623_v28  ;;  %1300 = vmatmul.msk.f32.gmra.mxu3 %vm309_vm2, %v79_v9 }
  0xed   :  { %v530_v32 = vpop.f32.mrf.mxu0  ;;  %1268 = vmatmul.msk.f32.gmra.mxu1 %vm309_vm2, %v47_v11 }
  0xee   :  { %v1071_v35 = vadd.f32 %v1580_v43, %v964_v29  ;;  %v871_v36 = vadd.f32 %v870_v30, %v530_v32 }
  0xef   :  { %v966_v41 = vpop.f32.mrf.mxu3 }
  0xf0   :  { %1135 = vst [vmem:[#allocation2 + $0x160] sm:$0xff] %v1071_v35  ;;  %1235 = vmatmul.msk.f32.gmra.mxu2 %vm309_vm2, %v305_v31  ;;  %v1040_v40 = vadd.f32 %v1580_v43, %v871_v36  ;;  %1203 = vmatmul.msk.f32.gmra.mxu0 %vm309_vm2, %v289_v33 }
  0xf2   :  { %1104 = vst [vmem:[#allocation2 + $0x68] sm:$0xff] %v1040_v40  ;;  %v873_v49 = vpop.f32.mrf.mxu1 }
  0xf3   :  { %v626_v47 = vpop.f32.mrf.mxu2 }
  0xf4   :  { %v967_v48 = vadd.f32 %v966_v41, %v626_v47  ;;  %1301 = vmatmul.msk.f32.gmra.mxu3 %vm309_vm2, %v80_v34 }
  0xf5   :  { %v533_v51 = vpop.f32.mrf.mxu0  ;;  %1269 = vmatmul.msk.f32.gmra.mxu1 %vm309_vm2, %v48_v38 }
  0xf6   :  { %v1072_v53 = vadd.f32 %v1580_v43, %v967_v48  ;;  %v874_v54 = vadd.f32 %v873_v49, %v533_v51 }
  0xf7   :  { %v969_v56 = vpop.f32.mrf.mxu3 }
  0xf8   :  { %1136 = vst [vmem:[#allocation2 + $0x168] sm:$0xff] %v1072_v53  ;;  %1236 = vmatmul.msk.f32.gmra.mxu2 %vm309_vm2, %v242_v50  ;;  %v1041_v55 = vadd.f32 %v1580_v43, %v874_v54  ;;  %1204 = vmatmul.msk.f32.gmra.mxu0 %vm309_vm2, %v194_v52 }
  0xfa   :  { %1105 = vst [vmem:[#allocation2 + $0x70] sm:$0xff] %v1041_v55  ;;  %v876_v59 = vpop.f32.mrf.mxu1 }
  0xfb   :  { %v629_v57 = vpop.f32.mrf.mxu2 }
  0xfc   :  { %v970_v58 = vadd.f32 %v969_v56, %v629_v57  ;;  %1302 = vmatmul.msk.f32.gmra.mxu3 %vm309_vm2, %v81_v37 }
  0xfd   :  { %v536_v61 = vpop.f32.mrf.mxu0  ;;  %1270 = vmatmul.msk.f32.gmra.mxu1 %vm309_vm2, %v49_v39 }
  0xfe   :  { %v1073_v63 = vadd.f32 %v1580_v43, %v970_v58  ;;  %v877_v0 = vadd.f32 %v876_v59, %v536_v61 }
  0xff   :  { %v972_v2 = vpop.f32.mrf.mxu3 }
 0x100   :  { %1137 = vst [vmem:[#allocation2 + $0x170] sm:$0xff] %v1073_v63  ;;  %1237 = vmatmul.msk.f32.gmra.mxu2 %vm309_vm2, %v306_v60  ;;  %v1042_v1 = vadd.f32 %v1580_v43, %v877_v0  ;;  %1205 = vmatmul.msk.f32.gmra.mxu0 %vm309_vm2, %v290_v62 }
 0x102   :  { %1106 = vst [vmem:[#allocation2 + $0x78] sm:$0xff] %v1042_v1  ;;  %v879_v5 = vpop.f32.mrf.mxu1 }
 0x103   :  { %v632_v3 = vpop.f32.mrf.mxu2 }
 0x104   :  { %v973_v4 = vadd.f32 %v972_v2, %v632_v3 }
 0x105   :  { %v539_v6 = vpop.f32.mrf.mxu0 }
 0x106   :  { %v1074_v7 = vadd.f32 %v1580_v43, %v973_v4  ;;  %v880_v8 = vadd.f32 %v879_v5, %v539_v6 }
 0x107   :  { %v975_v10 = vpop.f32.mrf.mxu3 }
 0x108   :  { %1138 = vst [vmem:[#allocation2 + $0x178] sm:$0xff] %v1074_v7  ;;  %v1043_v9 = vadd.f32 %v1580_v43, %v880_v8 }
 0x10a   :  { %1107 = vst [vmem:[#allocation2 + $0x80] sm:$0xff] %v1043_v9  ;;  %v882_v13 = vpop.f32.mrf.mxu1 }
 0x10b   :  { %v635_v11 = vpop.f32.mrf.mxu2 }
 0x10c   :  { %v976_v12 = vadd.f32 %v975_v10, %v635_v11 }
 0x10d   :  { %v542_v14 = vpop.f32.mrf.mxu0 }
 0x10e   :  { %v1075_v15 = vadd.f32 %v1580_v43, %v976_v12  ;;  %v883_v16 = vadd.f32 %v882_v13, %v542_v14 }
 0x10f   :  { %v978_v18 = vpop.f32.mrf.mxu3 }
 0x110   :  { %1139 = vst [vmem:[#allocation2 + $0x180] sm:$0xff] %v1075_v15  ;;  %v1044_v17 = vadd.f32 %v1580_v43, %v883_v16 }
 0x112   :  { %1108 = vst [vmem:[#allocation2 + $0x88] sm:$0xff] %v1044_v17  ;;  %v885_v21 = vpop.f32.mrf.mxu1 }
 0x113   :  { %v638_v19 = vpop.f32.mrf.mxu2 }
 0x114   :  { %v979_v20 = vadd.f32 %v978_v18, %v638_v19 }
 0x115   :  { %v545_v22 = vpop.f32.mrf.mxu0 }
 0x116   :  { %v1076_v23 = vadd.f32 %v1580_v43, %v979_v20  ;;  %v886_v24 = vadd.f32 %v885_v21, %v545_v22 }
 0x117   :  { %v981_v26 = vpop.f32.mrf.mxu3 }
 0x118   :  { %1140 = vst [vmem:[#allocation2 + $0x188] sm:$0xff] %v1076_v23  ;;  %v1045_v25 = vadd.f32 %v1580_v43, %v886_v24 }
 0x11a   :  { %1109 = vst [vmem:[#allocation2 + $0x90] sm:$0xff] %v1045_v25  ;;  %v888_v29 = vpop.f32.mrf.mxu1 }
 0x11b   :  { %v641_v27 = vpop.f32.mrf.mxu2 }
 0x11c   :  { %v982_v28 = vadd.f32 %v981_v26, %v641_v27 }
 0x11d   :  { %v548_v30 = vpop.f32.mrf.mxu0 }
 0x11e   :  { %v1077_v31 = vadd.f32 %v1580_v43, %v982_v28  ;;  %v889_v32 = vadd.f32 %v888_v29, %v548_v30 }
 0x11f   :  { %v984_v34 = vpop.f32.mrf.mxu3 }
 0x120   :  { %1141 = vst [vmem:[#allocation2 + $0x190] sm:$0xff] %v1077_v31  ;;  %v1046_v33 = vadd.f32 %v1580_v43, %v889_v32 }
 0x122   :  { %1110 = vst [vmem:[#allocation2 + $0x98] sm:$0xff] %v1046_v33  ;;  %v891_v37 = vpop.f32.mrf.mxu1 }
 0x123   :  { %v644_v35 = vpop.f32.mrf.mxu2 }
 0x124   :  { %v985_v36 = vadd.f32 %v984_v34, %v644_v35 }
 0x125   :  { %v551_v38 = vpop.f32.mrf.mxu0 }
 0x126   :  { %v1078_v39 = vadd.f32 %v1580_v43, %v985_v36  ;;  %v892_v40 = vadd.f32 %v891_v37, %v551_v38 }
 0x127   :  { %v987_v42 = vpop.f32.mrf.mxu3 }
 0x128   :  { %1142 = vst [vmem:[#allocation2 + $0x198] sm:$0xff] %v1078_v39  ;;  %v1047_v41 = vadd.f32 %v1580_v43, %v892_v40 }
 0x12a   :  { %1111 = vst [vmem:[#allocation2 + $0xa0] sm:$0xff] %v1047_v41  ;;  %v894_v46 = vpop.f32.mrf.mxu1 }
 0x12b   :  { %v647_v44 = vpop.f32.mrf.mxu2 }
 0x12c   :  { %v988_v45 = vadd.f32 %v987_v42, %v647_v44 }
 0x12d   :  { %v554_v47 = vpop.f32.mrf.mxu0 }
 0x12e   :  { %v1079_v48 = vadd.f32 %v1580_v43, %v988_v45  ;;  %v895_v49 = vadd.f32 %v894_v46, %v554_v47 }
 0x12f   :  { %v990_v51 = vpop.f32.mrf.mxu3 }
 0x130   :  { %1143 = vst [vmem:[#allocation2 + $0x1a0] sm:$0xff] %v1079_v48  ;;  %v1048_v50 = vadd.f32 %v1580_v43, %v895_v49 }
 0x132   :  { %1112 = vst [vmem:[#allocation2 + $0xa8] sm:$0xff] %v1048_v50  ;;  %v897_v54 = vpop.f32.mrf.mxu1 }
 0x133   :  { %v650_v52 = vpop.f32.mrf.mxu2 }
 0x134   :  { %v991_v53 = vadd.f32 %v990_v51, %v650_v52 }
 0x135   :  { %v557_v55 = vpop.f32.mrf.mxu0 }
 0x136   :  { %v1080_v56 = vadd.f32 %v1580_v43, %v991_v53  ;;  %v898_v57 = vadd.f32 %v897_v54, %v557_v55 }
 0x137   :  { %v993_v59 = vpop.f32.mrf.mxu3 }
 0x138   :  { %1144 = vst [vmem:[#allocation2 + $0x1a8] sm:$0xff] %v1080_v56  ;;  %v1049_v58 = vadd.f32 %v1580_v43, %v898_v57 }
 0x13a   :  { %1113 = vst [vmem:[#allocation2 + $0xb0] sm:$0xff] %v1049_v58  ;;  %v900_v62 = vpop.f32.mrf.mxu1 }
 0x13b   :  { %v653_v60 = vpop.f32.mrf.mxu2 }
 0x13c   :  { %v994_v61 = vadd.f32 %v993_v59, %v653_v60 }
 0x13d   :  { %v560_v63 = vpop.f32.mrf.mxu0 }
 0x13e   :  { %v1081_v0 = vadd.f32 %v1580_v43, %v994_v61  ;;  %v901_v1 = vadd.f32 %v900_v62, %v560_v63 }
 0x13f   :  { %v996_v3 = vpop.f32.mrf.mxu3 }
 0x140   :  { %1145 = vst [vmem:[#allocation2 + $0x1b0] sm:$0xff] %v1081_v0  ;;  %v1050_v2 = vadd.f32 %v1580_v43, %v901_v1 }
 0x142   :  { %1114 = vst [vmem:[#allocation2 + $0xb8] sm:$0xff] %v1050_v2  ;;  %v903_v6 = vpop.f32.mrf.mxu1 }
 0x143   :  { %v656_v4 = vpop.f32.mrf.mxu2 }
 0x144   :  { %v997_v5 = vadd.f32 %v996_v3, %v656_v4 }
 0x145   :  { %v563_v7 = vpop.f32.mrf.mxu0 }
 0x146   :  { %v1082_v8 = vadd.f32 %v1580_v43, %v997_v5  ;;  %v904_v9 = vadd.f32 %v903_v6, %v563_v7 }
 0x147   :  { %v999_v11 = vpop.f32.mrf.mxu3 }
 0x148   :  { %1146 = vst [vmem:[#allocation2 + $0x1b8] sm:$0xff] %v1082_v8  ;;  %v1051_v10 = vadd.f32 %v1580_v43, %v904_v9 }
 0x14a   :  { %1115 = vst [vmem:[#allocation2 + $0xc0] sm:$0xff] %v1051_v10  ;;  %v906_v14 = vpop.f32.mrf.mxu1 }
 0x14b   :  { %v659_v12 = vpop.f32.mrf.mxu2 }
 0x14c   :  { %v1000_v13 = vadd.f32 %v999_v11, %v659_v12 }
 0x14d   :  { %v566_v15 = vpop.f32.mrf.mxu0 }
 0x14e   :  { %v1083_v16 = vadd.f32 %v1580_v43, %v1000_v13  ;;  %v907_v17 = vadd.f32 %v906_v14, %v566_v15 }
 0x14f   :  { %v1002_v19 = vpop.f32.mrf.mxu3 }
 0x150   :  { %1147 = vst [vmem:[#allocation2 + $0x1c0] sm:$0xff] %v1083_v16  ;;  %v1052_v18 = vadd.f32 %v1580_v43, %v907_v17 }
 0x152   :  { %1116 = vst [vmem:[#allocation2 + $0xc8] sm:$0xff] %v1052_v18  ;;  %v909_v22 = vpop.f32.mrf.mxu1 }
 0x153   :  { %v662_v20 = vpop.f32.mrf.mxu2 }
 0x154   :  { %v1003_v21 = vadd.f32 %v1002_v19, %v662_v20 }
 0x155   :  { %v569_v23 = vpop.f32.mrf.mxu0 }
 0x156   :  { %v1084_v24 = vadd.f32 %v1580_v43, %v1003_v21  ;;  %v910_v25 = vadd.f32 %v909_v22, %v569_v23 }
 0x157   :  { %v1005_v27 = vpop.f32.mrf.mxu3 }
 0x158   :  { %1148 = vst [vmem:[#allocation2 + $0x1c8] sm:$0xff] %v1084_v24  ;;  %v1053_v26 = vadd.f32 %v1580_v43, %v910_v25 }
 0x15a   :  { %1117 = vst [vmem:[#allocation2 + $0xd0] sm:$0xff] %v1053_v26  ;;  %v912_v30 = vpop.f32.mrf.mxu1 }
 0x15b   :  { %v665_v28 = vpop.f32.mrf.mxu2 }
 0x15c   :  { %v1006_v29 = vadd.f32 %v1005_v27, %v665_v28 }
 0x15d   :  { %v572_v31 = vpop.f32.mrf.mxu0 }
 0x15e   :  { %v1085_v32 = vadd.f32 %v1580_v43, %v1006_v29  ;;  %v913_v33 = vadd.f32 %v912_v30, %v572_v31 }
 0x15f   :  { %v1008_v35 = vpop.f32.mrf.mxu3 }
 0x160   :  { %1149 = vst [vmem:[#allocation2 + $0x1d0] sm:$0xff] %v1085_v32  ;;  %v1054_v34 = vadd.f32 %v1580_v43, %v913_v33 }
 0x162   :  { %1118 = vst [vmem:[#allocation2 + $0xd8] sm:$0xff] %v1054_v34  ;;  %v915_v38 = vpop.f32.mrf.mxu1 }
 0x163   :  { %v668_v36 = vpop.f32.mrf.mxu2 }
 0x164   :  { %v1009_v37 = vadd.f32 %v1008_v35, %v668_v36 }
 0x165   :  { %v575_v39 = vpop.f32.mrf.mxu0 }
 0x166   :  { %v1086_v40 = vadd.f32 %v1580_v43, %v1009_v37  ;;  %v916_v41 = vadd.f32 %v915_v38, %v575_v39 }
 0x167   :  { %v1011_v44 = vpop.f32.mrf.mxu3 }
 0x168   :  { %1150 = vst [vmem:[#allocation2 + $0x1d8] sm:$0xff] %v1086_v40  ;;  %v1055_v42 = vadd.f32 %v1580_v43, %v916_v41 }
 0x16a   :  { %1119 = vst [vmem:[#allocation2 + $0xe0] sm:$0xff] %v1055_v42  ;;  %v918_v47 = vpop.f32.mrf.mxu1 }
 0x16b   :  { %v671_v45 = vpop.f32.mrf.mxu2 }
 0x16c   :  { %v1012_v46 = vadd.f32 %v1011_v44, %v671_v45 }
 0x16d   :  { %v578_v48 = vpop.f32.mrf.mxu0 }
 0x16e   :  { %v1087_v49 = vadd.f32 %v1580_v43, %v1012_v46  ;;  %v919_v50 = vadd.f32 %v918_v47, %v578_v48 }
 0x16f   :  { %v1014_v52 = vpop.f32.mrf.mxu3 }
 0x170   :  { %1151 = vst [vmem:[#allocation2 + $0x1e0] sm:$0xff] %v1087_v49  ;;  %v1056_v51 = vadd.f32 %v1580_v43, %v919_v50 }
 0x172   :  { %1120 = vst [vmem:[#allocation2 + $0xe8] sm:$0xff] %v1056_v51  ;;  %v921_v55 = vpop.f32.mrf.mxu1 }
 0x173   :  { %v674_v53 = vpop.f32.mrf.mxu2 }
 0x174   :  { %v1015_v54 = vadd.f32 %v1014_v52, %v674_v53 }
 0x175   :  { %v581_v56 = vpop.f32.mrf.mxu0 }
 0x176   :  { %v1088_v57 = vadd.f32 %v1580_v43, %v1015_v54  ;;  %v922_v58 = vadd.f32 %v921_v55, %v581_v56 }
 0x177   :  { %v1017_v60 = vpop.f32.mrf.mxu3 }
 0x178   :  { %1152 = vst [vmem:[#allocation2 + $0x1e8] sm:$0xff] %v1088_v57  ;;  %v1057_v59 = vadd.f32 %v1580_v43, %v922_v58 }
 0x17a   :  { %1121 = vst [vmem:[#allocation2 + $0xf0] sm:$0xff] %v1057_v59  ;;  %v924_v63 = vpop.f32.mrf.mxu1 }
 0x17b   :  { %v677_v61 = vpop.f32.mrf.mxu2 }
 0x17c   :  { %v1018_v62 = vadd.f32 %v1017_v60, %v677_v61 }
 0x17d   :  { %v584_v0 = vpop.f32.mrf.mxu0 }
 0x17e   :  { %v1089_v1 = vadd.f32 %v1580_v43, %v1018_v62  ;;  %v925_v2 = vadd.f32 %v924_v63, %v584_v0 }
 0x17f   :  { %v1020_v4 = vpop.f32.mrf.mxu3 }
 0x180   :  { %1153 = vst [vmem:[#allocation2 + $0x1f0] sm:$0xff] %v1089_v1  ;;  %v1058_v3 = vadd.f32 %v1580_v43, %v925_v2 }
 0x182   :  { %1122 = vst [vmem:[#allocation2 + $0xf8] sm:$0xff] %v1058_v3 }
 0x183   :  { %v680_v5 = vpop.f32.mrf.mxu2 }
 0x184   :  { %v1021_v6 = vadd.f32 %v1020_v4, %v680_v5 }
 0x186   :  { %v1090_v7 = vadd.f32 %v1580_v43, %v1021_v6 }
 0x188   :  { %1154 = vst [vmem:[#allocation2 + $0x1f8] sm:$0xff] %v1090_v7 }
 0x189   :  { %1167 = dma.vmem_to_hbm [thread:$0]  %s1160_s7, 8192, %s1162_s9, [#allocation3], %s1336_s10, %s1336_s10, %s1337_s11  }
 0x18a   :  { %1333 = dma.done.wait [#allocation3], 8192  }
 0x18b   :  { %1334 = vsyncadd [#allocation3], 4294959104 }
 0x18c   :  { %1172 = vsyncpa [#allocation3], 1 }

</bundles_post_ra>
